<compile_context>
chip_gen: v7x
topology: tpu7x:2x2x1
jax: 0.10.0
libtpu: 0.0.40
codegen_flags: <defaults>
</compile_context>

<pallas_src>
import jax
import jax.numpy as jnp
from jax import lax
from jax.experimental import pallas as pl
from jax.experimental.pallas import tpu as pltpu

EPS = 1e-5


# --------------------------------------------------------------------------------------
# Kernel 1: ReLU + banded temporal conv + per-step partial BN statistics (no y writeback)
# --------------------------------------------------------------------------------------
def _conv_stats_kernel(x_ref, a_ref, ssum_ref, ssq_ref):
    # x_ref   : (1, C_in*D, hw_blk)   native NCDHW slab of one image (HW on lanes)
    # a_ref   : (C_out*D, C_in*D)     block-banded temporal-conv matrix (resident)
    # ssum_ref, ssq_ref : (1, 1, C_out*D) per-step partial sums over hw
    k_out = a_ref.shape[0]
    x = jnp.maximum(x_ref[0], 0.0)                                     # ReLU, lane-dense
    y = jnp.dot(a_ref[...], x, preferred_element_type=jnp.float32)     # (C_out*D, hw_blk)
    ssum_ref[...] = jnp.sum(y, axis=1).reshape(1, 1, k_out)
    ssq_ref[...] = jnp.sum(y * y, axis=1).reshape(1, 1, k_out)


# --------------------------------------------------------------------------------------
# Kernel 2: ReLU + banded temporal conv (scale folded into A) + shift  ->  final output
# --------------------------------------------------------------------------------------
def _conv_bn_kernel(x_ref, a_ref, shift_ref, o_ref):
    # x_ref : (1, C_in*D, hw_blk);  a_ref : (C_out*D, C_in*D) scale-folded
    # shift_ref : (C_out*D, 1);     o_ref : (1, C_out*D, hw_blk)
    x = jnp.maximum(x_ref[0], 0.0)
    y = jnp.dot(a_ref[...], x, preferred_element_type=jnp.float32)
    o_ref[0] = (y + shift_ref[...]).astype(o_ref.dtype)


# --------------------------------------------------------------------------------------
# Generation-aware VMEM budget + HW block picking
# --------------------------------------------------------------------------------------
def _vmem_limit_bytes():
    try:
        info = pltpu.get_tpu_info()
        cap = int(getattr(info, "vmem_capacity_bytes", 128 << 20))
    except Exception:
        cap = 128 << 20
    # ~48 MiB on v7x (64 MiB physical), ~96 MiB on v5e/v6e (128 MiB physical)
    return int(min(cap * 3 // 4, 96 << 20))


def _pick_hw_block(hw, n, k_in, k_out, budget_bytes):
    if hw % 128 != 0:
        # Full-extent block along HW (legal per BlockSpec rules).
        # TODO(synk): for very large non-128-aligned spatial sizes, pad HW to a multiple
        #             of 128 in the wrapper instead of using a single HW step.
        return hw
    per_col = 3 * (k_in + k_out) * 4          # double-buffered in/out + temporaries, f32
    blk = max(128, min(hw, (budget_bytes // per_col) // 128 * 128))
    while hw % blk != 0:
        blk -= 128
    # Prefer >= 4 total grid steps (pipelining overlap; v7x dual-TensorCore sharding).
    while n * (hw // blk) < 4 and blk % 256 == 0 and hw % (blk // 2) == 0:
        blk //= 2
    return blk


# --------------------------------------------------------------------------------------
# Wrapper
# --------------------------------------------------------------------------------------
def vani_conv3d_temporal_3x1x1(x_ncdhw, w_pt, gamma, beta, *, hw_block=None):
    """x_ncdhw: (N, C_in, D, H, W); w_pt: (C_out, C_in, 3, 1, 1); gamma/beta: (C_out,)."""
    N, C_in, D, H, W = x_ncdhw.shape
    C_out = w_pt.shape[0]
    HW = H * W
    K_in = C_in * D
    K_out = C_out * D

    # Free, contiguous reshape of the native NCDHW tensor (no HBM transpose).
    x2 = x_ncdhw.reshape(N, K_in, HW).astype(jnp.float32)

    # Block-banded conv matrix A (C_out*D, C_in*D):
    #   A[o*D+do, c*D+di] = w[o, c, k] where k = di - do + 1 in {0,1,2}
    # (zero padding [1,0,0] along D is encoded by the band boundaries).
    w3 = w_pt[:, :, :, 0, 0].astype(jnp.float32)              # (C_out, C_in, 3)
    d_out = jnp.arange(D)[:, None]
    d_in = jnp.arange(D)[None, :]
    k = d_in - d_out + 1
    valid = ((k >= 0) & (k <= 2)).astype(jnp.float32)          # (D, D)
    band = w3[:, :, jnp.clip(k, 0, 2)] * valid[None, None]     # (C_out, C_in, D, D)
    A = jnp.transpose(band, (0, 2, 1, 3)).reshape(K_out, K_in)

    vmem_limit = _vmem_limit_bytes()
    if hw_block is None:
        hw_block = _pick_hw_block(HW, N, K_in, K_out, max(2 << 20, vmem_limit // 8))
    assert HW % hw_block == 0
    n_hw = HW // hw_block

    cparams = pltpu.CompilerParams(
        dimension_semantics=("parallel", "parallel"),
        vmem_limit_bytes=vmem_limit)

    # ---- pass 1: ReLU + temporal conv, per-step partial BN statistics only ----------
    psum, psq = pl.pallas_call(
        _conv_stats_kernel,
        out_shape=(
            jax.ShapeDtypeStruct((N * n_hw, 1, K_out), jnp.float32),
            jax.ShapeDtypeStruct((N * n_hw, 1, K_out), jnp.float32),
        ),
        grid=(N, n_hw),
        in_specs=[
            pl.BlockSpec((1, K_in, hw_block), lambda n, h: (n, 0, h)),
            pl.BlockSpec((K_out, K_in), lambda n, h: (0, 0)),          # resident weights
        ],
        out_specs=(
            pl.BlockSpec((1, 1, K_out), lambda n, h: (n * n_hw + h, 0, 0)),
            pl.BlockSpec((1, 1, K_out), lambda n, h: (n * n_hw + h, 0, 0)),
        ),
        compiler_params=cparams,
    )(x2, A)

    # ---- finalize BN statistics (tiny, plain JAX) ------------------------------------
    count = jnp.float32(N * D * HW)
    sum_c = jnp.sum(psum, axis=(0, 1)).reshape(C_out, D).sum(axis=1)
    sq_c = jnp.sum(psq, axis=(0, 1)).reshape(C_out, D).sum(axis=1)
    mean = sum_c / count
    var = jnp.maximum(sq_c / count - mean * mean, 0.0)        # biased var (training BN)
    inv = lax.rsqrt(var + EPS)
    scale = gamma.astype(jnp.float32) * inv                    # (C_out,)
    shift = beta.astype(jnp.float32) - mean * scale            # (C_out,)
    scale_rows = jnp.repeat(scale, D).reshape(K_out, 1)
    shift_rows = jnp.repeat(shift, D).reshape(K_out, 1)
    A_scaled = A * scale_rows                                  # fold BN scale into A

    # ---- pass 2: recompute conv + apply BN, write final NCDHW-flat output ------------
    out3 = pl.pallas_call(
        _conv_bn_kernel,
        out_shape=jax.ShapeDtypeStruct((N, K_out, HW), jnp.float32),
        grid=(N, n_hw),
        in_specs=[
            pl.BlockSpec((1, K_in, hw_block), lambda n, h: (n, 0, h)),
            pl.BlockSpec((K_out, K_in), lambda n, h: (0, 0)),          # resident weights
            pl.BlockSpec((K_out, 1), lambda n, h: (0, 0)),             # resident shift
        ],
        out_specs=pl.BlockSpec((1, K_out, hw_block), lambda n, h: (n, 0, h)),
        compiler_params=cparams,
    )(x2, A_scaled, shift_rows)

    # Free metadata reshape back to PyTorch NCDHW (no transpose).
    return out3.reshape(N, C_out, D, H, W)


# --------------------------------------------------------------------------------------
# Pure-JAX reference of the PyTorch forward (training-mode BN)
# --------------------------------------------------------------------------------------
def _reference(x_ncdhw, w_pt, gamma, beta):
    xr = jnp.maximum(x_ncdhw, 0.0)
    y = lax.conv_general_dilated(
        xr, w_pt,
        window_strides=(1, 1, 1),
        padding=((1, 1), (0, 0), (0, 0)),
        dimension_numbers=("NCDHW", "OIDHW", "NCDHW"),
    )
    mean = jnp.mean(y, axis=(0, 2, 3, 4), keepdims=True)
    var = jnp.mean((y - mean) ** 2, axis=(0, 2, 3, 4), keepdims=True)
    yhat = (y - mean) * lax.rsqrt(var + EPS)
    return yhat * gamma.reshape(1, -1, 1, 1, 1) + beta.reshape(1, -1, 1, 1, 1)


if __name__ == "__main__":
    # Small shapes consistent with Conv3d(C_in, C_out, [3,1,1], padding=[1,0,0]).
    N, C_in, C_out, D, H, W = 2, 4, 8, 8, 16, 16

    key = jax.random.PRNGKey(0)
    kx, kw, kg, kb = jax.random.split(key, 4)
    x = jax.random.normal(kx, (N, C_in, D, H, W), dtype=jnp.float32)
    w = jax.random.normal(kw, (C_out, C_in, 3, 1, 1), dtype=jnp.float32) * 0.1
    gamma = 1.0 + 0.1 * jax.random.normal(kg, (C_out,), dtype=jnp.float32)
    beta = 0.1 * jax.random.normal(kb, (C_out,), dtype=jnp.float32)

    fwd = jax.jit(vani_conv3d_temporal_3x1x1)
    out = jax.block_until_ready(fwd(x, w, gamma, beta))
    ref = jax.block_until_ready(_reference(x, w, gamma, beta))

    assert out.shape == (N, C_out, D, H, W), out.shape
    err = float(jnp.max(jnp.abs(out - ref)))
    assert jnp.allclose(out, ref, rtol=1e-3, atol=1e-3), err
    print("KERNEL_OK")
</pallas_src>

<mosaic_0001>
module attributes {stable_mosaic.version = 11 : i64} {
  func.func @_conv_stats_kernel(%arg0: i32, %arg1: i32, %arg2: memref<1x32x128xf32, #tpu.memory_space<vmem>>, %arg3: memref<64x32xf32, #tpu.memory_space<vmem>>, %arg4: memref<1x1x64xf32, #tpu.memory_space<vmem>>, %arg5: memref<1x1x64xf32, #tpu.memory_space<vmem>>) attributes {dimension_semantics = [#tpu.dimension_semantics<parallel>, #tpu.dimension_semantics<parallel>], iteration_bounds = array<i64: 2, 2>, scalar_prefetch = 0 : i64, scratch_operands = 0 : i64, tpu.core_type = #tpu.core_type<tc>, window_params = [{transform_indices = @transform_0, window_bounds = array<i64: 1, 32, 128>}, {pipeline_mode = #tpu.pipeline_mode<synchronous>, transform_indices = @transform_1, window_bounds = array<i64: 64, 32>}, {transform_indices = @transform_2, window_bounds = array<i64: 1, 1, 64>}, {transform_indices = @transform_3, window_bounds = array<i64: 1, 1, 64>}]} {
    %c0 = arith.constant 0 : index
    %c0_0 = arith.constant 0 : index
    %c0_1 = arith.constant 0 : index
    %0 = vector.load %arg2[%c0, %c0_0, %c0_1] : memref<1x32x128xf32, #tpu.memory_space<vmem>>, vector<1x32x128xf32>
    %1 = vector.shape_cast %0 : vector<1x32x128xf32> to vector<32x128xf32>
    %cst = arith.constant 0.000000e+00 : f32
    %2 = vector.broadcast %cst : f32 to vector<32x128xf32>
    %3 = arith.maximumf %1, %2 : vector<32x128xf32>
    %c0_2 = arith.constant 0 : index
    %c0_3 = arith.constant 0 : index
    %4 = vector.load %arg3[%c0_2, %c0_3] : memref<64x32xf32, #tpu.memory_space<vmem>>, vector<64x32xf32>
    %cst_4 = arith.constant dense<0.000000e+00> : vector<64x128xf32>
    %5 = tpu.matmul %4, %3, %cst_4 {dimension_numbers = #tpu.dot_dimension_numbers<[1], [0], [0], [1], [0, 0, 1, 1], [], []>} : vector<64x32xf32>, vector<32x128xf32>, vector<64x128xf32> -> vector<64x128xf32>
    %cst_5 = arith.constant dense<0.000000e+00> : vector<64xf32>
    %6 = vector.multi_reduction <add>, %5, %cst_5 [1] : vector<64x128xf32> to vector<64xf32>
    %7 = vector.shape_cast %6 : vector<64xf32> to vector<1x1x64xf32>
    %c0_6 = arith.constant 0 : index
    %c0_7 = arith.constant 0 : index
    %c0_8 = arith.constant 0 : index
    %8 = vector.load %arg4[%c0_6, %c0_7, %c0_8] : memref<1x1x64xf32, #tpu.memory_space<vmem>>, vector<1x1x64xf32>
    tpu.vector_store %arg4[%c0_6, %c0_7, %c0_8], %7 {strides = array<i32>} : memref<1x1x64xf32, #tpu.memory_space<vmem>>, vector<1x1x64xf32>,
    %9 = arith.mulf %5, %5 : vector<64x128xf32>
    %cst_9 = arith.constant dense<0.000000e+00> : vector<64xf32>
    %10 = vector.multi_reduction <add>, %9, %cst_9 [1] : vector<64x128xf32> to vector<64xf32>
    %11 = vector.shape_cast %10 : vector<64xf32> to vector<1x1x64xf32>
    %c0_10 = arith.constant 0 : index
    %c0_11 = arith.constant 0 : index
    %c0_12 = arith.constant 0 : index
    %12 = vector.load %arg5[%c0_10, %c0_11, %c0_12] : memref<1x1x64xf32, #tpu.memory_space<vmem>>, vector<1x1x64xf32>
    tpu.vector_store %arg5[%c0_10, %c0_11, %c0_12], %11 {strides = array<i32>} : memref<1x1x64xf32, #tpu.memory_space<vmem>>, vector<1x1x64xf32>,
    return
  }
  func.func @transform_0(%arg0: i32, %arg1: i32) -> (i32, i32, i32) {
    %c0_i32 = arith.constant 0 : i32
    %c0_i32_0 = arith.constant 0 : i32
    return %arg0, %c0_i32, %arg1 : i32, i32, i32
  }
  func.func @transform_1(%arg0: i32, %arg1: i32) -> (i32, i32) {
    %c0_i32 = arith.constant 0 : i32
    %c0_i32_0 = arith.constant 0 : i32
    %c0_i32_1 = arith.constant 0 : i32
    return %c0_i32, %c0_i32_0 : i32, i32
  }
  func.func @transform_2(%arg0: i32, %arg1: i32) -> (i32, i32, i32) {
    %c2_i32 = arith.constant 2 : i32
    %0 = arith.muli %arg0, %c2_i32 : i32
    %1 = arith.addi %0, %arg1 : i32
    %c0_i32 = arith.constant 0 : i32
    %c0_i32_0 = arith.constant 0 : i32
    %c0_i32_1 = arith.constant 0 : i32
    return %1, %c0_i32, %c0_i32_0 : i32, i32, i32
  }
  func.func @transform_3(%arg0: i32, %arg1: i32) -> (i32, i32, i32) {
    %c2_i32 = arith.constant 2 : i32
    %0 = arith.muli %arg0, %c2_i32 : i32
    %1 = arith.addi %0, %arg1 : i32
    %c0_i32 = arith.constant 0 : i32
    %c0_i32_0 = arith.constant 0 : i32
    %c0_i32_1 = arith.constant 0 : i32
    return %1, %c0_i32, %c0_i32_0 : i32, i32, i32
  }
}

module attributes {stable_mosaic.version = 11 : i64} {
  func.func @_conv_bn_kernel(%arg0: i32, %arg1: i32, %arg2: memref<1x32x128xf32, #tpu.memory_space<vmem>>, %arg3: memref<64x32xf32, #tpu.memory_space<vmem>>, %arg4: memref<64x1xf32, #tpu.memory_space<vmem>>, %arg5: memref<1x64x128xf32, #tpu.memory_space<vmem>>) attributes {dimension_semantics = [#tpu.dimension_semantics<parallel>, #tpu.dimension_semantics<parallel>], iteration_bounds = array<i64: 2, 2>, scalar_prefetch = 0 : i64, scratch_operands = 0 : i64, tpu.core_type = #tpu.core_type<tc>, window_params = [{transform_indices = @transform_0, window_bounds = array<i64: 1, 32, 128>}, {pipeline_mode = #tpu.pipeline_mode<synchronous>, transform_indices = @transform_1, window_bounds = array<i64: 64, 32>}, {pipeline_mode = #tpu.pipeline_mode<synchronous>, transform_indices = @transform_2, window_bounds = array<i64: 64, 1>}, {transform_indices = @transform_3, window_bounds = array<i64: 1, 64, 128>}]} {
    %c0 = arith.constant 0 : index
    %c0_0 = arith.constant 0 : index
    %c0_1 = arith.constant 0 : index
    %0 = vector.load %arg2[%c0, %c0_0, %c0_1] : memref<1x32x128xf32, #tpu.memory_space<vmem>>, vector<1x32x128xf32>
    %1 = vector.shape_cast %0 : vector<1x32x128xf32> to vector<32x128xf32>
    %cst = arith.constant 0.000000e+00 : f32
    %2 = vector.broadcast %cst : f32 to vector<32x128xf32>
    %3 = arith.maximumf %1, %2 : vector<32x128xf32>
    %c0_2 = arith.constant 0 : index
    %c0_3 = arith.constant 0 : index
    %4 = vector.load %arg3[%c0_2, %c0_3] : memref<64x32xf32, #tpu.memory_space<vmem>>, vector<64x32xf32>
    %cst_4 = arith.constant dense<0.000000e+00> : vector<64x128xf32>
    %5 = tpu.matmul %4, %3, %cst_4 {dimension_numbers = #tpu.dot_dimension_numbers<[1], [0], [0], [1], [0, 0, 1, 1], [], []>} : vector<64x32xf32>, vector<32x128xf32>, vector<64x128xf32> -> vector<64x128xf32>
    %c0_5 = arith.constant 0 : index
    %c0_6 = arith.constant 0 : index
    %6 = vector.load %arg4[%c0_5, %c0_6] : memref<64x1xf32, #tpu.memory_space<vmem>>, vector<64x1xf32>
    %7 = vector.broadcast %6 : vector<64x1xf32> to vector<64x128xf32>
    %8 = arith.addf %5, %7 : vector<64x128xf32>
    %c0_7 = arith.constant 0 : index
    %c0_8 = arith.constant 0 : index
    %c0_9 = arith.constant 0 : index
    %9 = vector.load %arg5[%c0_7, %c0_8, %c0_9] : memref<1x64x128xf32, #tpu.memory_space<vmem>>, vector<1x64x128xf32>
    %10 = vector.shape_cast %9 : vector<1x64x128xf32> to vector<64x128xf32>
    %11 = vector.shape_cast %8 : vector<64x128xf32> to vector<1x64x128xf32>
    tpu.vector_store %arg5[%c0_7, %c0_8, %c0_9], %11 {strides = array<i32>} : memref<1x64x128xf32, #tpu.memory_space<vmem>>, vector<1x64x128xf32>,
    return
  }
  func.func @transform_0(%arg0: i32, %arg1: i32) -> (i32, i32, i32) {
    %c0_i32 = arith.constant 0 : i32
    %c0_i32_0 = arith.constant 0 : i32
    return %arg0, %c0_i32, %arg1 : i32, i32, i32
  }
  func.func @transform_1(%arg0: i32, %arg1: i32) -> (i32, i32) {
    %c0_i32 = arith.constant 0 : i32
    %c0_i32_0 = arith.constant 0 : i32
    %c0_i32_1 = arith.constant 0 : i32
    return %c0_i32, %c0_i32_0 : i32, i32
  }
  func.func @transform_2(%arg0: i32, %arg1: i32) -> (i32, i32) {
    %c0_i32 = arith.constant 0 : i32
    %c0_i32_0 = arith.constant 0 : i32
    %c0_i32_1 = arith.constant 0 : i32
    return %c0_i32, %c0_i32_0 : i32, i32
  }
  func.func @transform_3(%arg0: i32, %arg1: i32) -> (i32, i32, i32) {
    %c0_i32 = arith.constant 0 : i32
    %c0_i32_0 = arith.constant 0 : i32
    return %arg0, %c0_i32, %arg1 : i32, i32, i32
  }
}

</mosaic_0001>

<bundles_post_ra>
// kernel: mul.19
= control target key start
LH: loop header
LB: loop body
LE: loop exit
PB: predicated region body
PF: predicated region fallthrough
CT: control target
= control target key end

     0   :  { %s67_s10 = smov 56   ;;  %s68_s11 = smov 40   ;;  %vm3_vm0 = vcmask 64512   ;;  %vm9_vm1 = vcmask 523712   ;;  %vm15_vm2 = vcmask 458112   ;;  %vm21_vm3 = vcmask 392512   ;;  %s111_s0 = inlined_call_operand.vmem [shape: f32[8,8], index: 0, kind: input, shape index: {}]   ;;  %s112_s1 = inlined_call_operand.vmem [shape: f32[64], index: 1, kind: output, shape index: {}]  }
   0x1   :  { %v53_v0 = vld [vmem:[%s111_s0 + $0x7] sm:$0x1]   ;;  %v55_v1 = vld [vmem:[%s111_s0 + $0x5] sm:$0x1]   ;;  %v54_v2 = vld [vmem:[%s111_s0 + $0x6] sm:$0x1]  }
   0x2   :  { %7 = vrot.lane.b32.xlu0 %v53_v0, %s67_s10  ;;  %19 = vrot.lane.b32.xlu1 %v55_v1, %s68_s11  ;;  %v56_v3 = vld [vmem:[%s111_s0 + $0x4] sm:$0x1]   ;;  %v2_v4 = vld [vmem:[%s111_s0] sm:$0x1]   ;;  %s69_s18 = smov 48   ;;  %s70_s19 = smov 32  }
   0x3   :  { %4 = vst.msk [vmem:[#allocation0] sm:$0x1] %vm3_vm0, %v2_v4   ;;  %v57_v5 = vld [vmem:[%s111_s0 + $0x3] sm:$0x1]   ;;  %v58_v6 = vld [vmem:[%s111_s0 + $0x2] sm:$0x1]  }
   0x4   :  { %s71_s24 = smov 24   ;;  %s72_s25 = smov 16   ;;  %v59_v7 = vld [vmem:[%s111_s0 + $0x1] sm:$0x1]   ;;  %vm27_vm4 = vcmask 326912   ;;  %vm33_vm5 = vcmask 261312  }
   0x5   :  { %s73_s0 = smov 8   ;;  %vm39_vm6 = vcmask 195712   ;;  %vm45_vm7 = vcmask 130112  }
   0x6   :  { %13 = vrot.lane.b32.xlu0 %v54_v2, %s69_s18  ;;  %25 = vrot.lane.b32.xlu1 %v56_v3, %s70_s19 }
   0xa   :  { %31 = vrot.lane.b32.xlu0 %v57_v5, %s71_s24  ;;  %37 = vrot.lane.b32.xlu1 %v58_v6, %s72_s25 }
   0xe   :  { %43 = vrot.lane.b32.xlu0 %v59_v7, %s73_s0 }
  0x74   :  { %v8_v8 = vpop.permute.xlu0 %7   ;;  %v20_v9 = vpop.permute.xlu1 %19  }
  0x75   :  { %10 = vst.msk [vmem:[#allocation0] sm:$0x1] %vm9_vm1, %v8_v8  }
  0x78   :  { %v14_v10 = vpop.permute.xlu0 %13   ;;  %v26_v11 = vpop.permute.xlu1 %25  }
  0x79   :  { %16 = vst.msk [vmem:[#allocation0] sm:$0x1] %vm15_vm2, %v14_v10  }
  0x7a   :  { %22 = vst.msk [vmem:[#allocation0] sm:$0x1] %vm21_vm3, %v20_v9  }
  0x7b   :  { %28 = vst.msk [vmem:[#allocation0] sm:$0x1] %vm27_vm4, %v26_v11  }
  0x7c   :  { %v32_v12 = vpop.permute.xlu0 %31   ;;  %v38_v13 = vpop.permute.xlu1 %37  }
  0x7d   :  { %34 = vst.msk [vmem:[#allocation0] sm:$0x1] %vm33_vm5, %v32_v12  }
  0x7e   :  { %40 = vst.msk [vmem:[#allocation0] sm:$0x1] %vm39_vm6, %v38_v13  }
  0x80   :  { %v44_v14 = vpop.permute.xlu0 %43  }
  0x81   :  { %46 = vst.msk [vmem:[#allocation0] sm:$0x1] %vm45_vm7, %v44_v14  }
  0x88   :  { %v50_v15 = vld [vmem:[#allocation0] sm:$0x1] }
  0x89   :  { %52 = vst [vmem:[%s112_s1] sm:$0x1] %v50_v15 }

// kernel: vani_conv3d_temporal_3x1x1.2
= control target key start
LH: loop header
LB: loop body
LE: loop exit
PB: predicated region body
PF: predicated region fallthrough
CT: control target
= control target key end

     0   :  { %s1474_s0 = inlined_call_operand.hbm [shape: f32[2,32,256], index: 0, kind: input, shape index: {}]   ;;  %s1475_s1 = inlined_call_operand.hbm [shape: f32[64,32], index: 1, kind: input, shape index: {}]   ;;  %s1476_s2 = inlined_call_operand.hbm [shape: f32[4,1,64], index: 2, kind: output, shape index: {0}]   ;;  %s1477_s3 = inlined_call_operand.hbm [shape: f32[4,1,64], index: 3, kind: output, shape index: {1}]  }
   0x1   :  { %1495 = sst [smem:[#allocation21_spill]] %s1475_s1 }
   0x2   :  { %1496 = sst [smem:[#allocation22_spill]] %s1476_s2 }
   0x3   :  { %1497 = sst [smem:[#allocation23_spill]] %s1477_s3 }
   0x4   :  { %9 = vsyncpa [#allocation3], 0 }
   0x5   :  { %11 = vsyncpa [#allocation3 + $0x1], 0 }
   0x6   :  { %12 = vsyncpa [#allocation6], 0 }
   0x7   :  { %13 = vsyncpa [#allocation4], 0 }
   0x8   :  { %15 = vsyncpa [#allocation4 + $0x1], 0 }
   0x9   :  { %16 = vsyncpa [#allocation9], 0 }
   0xa   :  { %18 = vsyncpa [#allocation9 + $0x1], 0  ;;  %s1135_s12 = smov 0   ;;  %s1137_s13 = smov 0  }
   0xb   :  { %s1139_s14 = smov 0   ;;  %s1141_s15 = smov 0  }
   0xc   :  { %s1143_s16 = smov 0   ;;  %s1145_s17 = smov 0  }
   0xd   :  { %s1147_s18 = smov 0   ;;  %s1149_s19 = smov 0  }
   0xe   :  { %s1151_s20 = smov 0   ;;  %s1153_s21 = smov 0  }
   0xf   :  { %s1155_s22 = smov 0  }
  0x10 LB: > { %1498 = sst [smem:[#allocation14_spill]] %s1066_s12  ;;  %s696_s23 = sadd.s32 4294967295, %s1106_s22   ;;  %s1106_s22 = sphi %s1155_s22, %s24_s22   ;;  %s1102_s21 = sphi %s1153_s21, %s1543_s21   ;;  %s1098_s20 = sphi %s1151_s20, %s1542_s20   ;;  %s1094_s19 = sphi %s1149_s19, %s1541_s19   ;;  %s1090_s18 = sphi %s1147_s18, %s1540_s18   ;;  %s1086_s17 = sphi %s1145_s17, %s1539_s17   ;;  %s1082_s16 = sphi %s1143_s16, %s1538_s16   ;;  %s1078_s15 = sphi %s1141_s15, %s1537_s15   ;;  %s1074_s14 = sphi %s1139_s14, %s1536_s14   ;;  %s1070_s13 = sphi %s1137_s13, %s1535_s13   ;;  %s1066_s12 = sphi %s1135_s12, %s1534_s12  }
  0x11   : > { %1499 = sst [smem:[#allocation15_spill]] %s1070_s13  ;;  %s697_s24 = sadd.s32 4294967294, %s1106_s22  }
  0x12   : > { %1500 = sst [smem:[#allocation16_spill]] %s1090_s18  ;;  %p52_p0 = scmp.ne.s32.totalorder %s1086_s17, %s1082_s16 }
  0x13   : > { %1501 = sst [smem:[#allocation17_spill]] %s1094_s19  ;;  %p53_p1 = scmp.eq.s32.totalorder %s1106_s22, 0 }
  0x14   : > { %1502 = sst [smem:[#allocation18_spill]] %s1106_s22  ;;  %p58_p2 = scmp.ne.s32.totalorder %s1082_s16, %s1078_s15 }
  0x15   : > { %p1195_p3 = scmp.eq.s32.totalorder %s696_s23, 0  ;;  %p1200_p4 = por %p53_p1, %p52_p0 }
  0x16   : > { %p106_p5 = scmp.ne.s32.totalorder %s1074_s14, %s1070_s13  ;;  %p107_p7 = scmp.eq.s32.totalorder %s696_s23, 3 }
  0x17   : > { %s1503_s26 = scalar_select %p1195_p3, 1, 0 }
  0x18   : > { %p1208_p6 = por %p1195_p3, %p58_p2  ;;  %p112_p8 = scmp.ne.s32.totalorder %s1070_s13, %s1066_s12 }
  0x19   : > { %p113_p9 = scmp.eq.s32.totalorder %s697_s24, 3  ;;  %p1214_p10 = por %p107_p7, %p106_p5 }
  0x1a   : > { %s1505_s29 = scalar_select %p1208_p6, 1, 0 }
  0x1b   : > { %s1506_s30 = scalar_select %p1214_p10, 1, 0 }
  0x1c   : > { %p702_p11 = scmp.ge.s32.totalorder %s1106_s22, 1  ;;  %p1219_p12 = por %p113_p9, %p112_p8 }
  0x1d   : > { %1507 = sst [smem:[#allocation19_spill]] %s1506_s30  ;;  %p150_p13 = scmp.lt.s32.totalorder %s1106_s22, 5 }
  0x1e   : > { %s1508_s4 = scalar_select %p1219_p12, 1, 0 }
  0x1f   : > { %p1224_p0 = pnand %p702_p11, %p150_p13  ;;  %s1108_s6 = smov [#allocation5]  }
  0x20   : > { %1509 = sst [smem:[#allocation20_spill]] %s1508_s4  ;;  %s162_s7 = sshll.u32 %s1108_s6, 4  ;;  %s163_s7 = int_to_ptr.vmem [resolvable:$true] %s162_s7 }
  0x21   : > { %s1510_s5 = scalar_select %p1224_p0, 1, 0 }
  0x22   : > { %p779_p1 = pneg %p1224_p0  ;;  %p795_p2 = scmp.lt.s32.totalorder %s1106_s22, 4 }
  0x23   : > { %s1513_s1 = sld [smem:[#allocation21_spill]] }
  0x24   : > { %p1233_p5 = pnand %p779_p1, %p1195_p3  ;;  %p1239_p7 = pnand %p795_p2, %p1200_p4 }
  0x26   : > { %s1512_s9 = scalar_select %p1239_p7, 1, 0 }
  0x27   : > { %p892_p9 = pneg %p1233_p5 }
  0x29   : > { %s890_s15 = scalar_lea.hbm %s1513_s1, 1024 }
  0x2a   : > { %p891_p8 = scmp.ne.s32.totalorder %s1513_s1, %s890_s15  ;;  %p897_p1 = scmp.lt.u32.totalorder %s890_s15, %s1513_s1 }
  0x2c   : > { %p893_p11 = pnand %p892_p9, %p891_p8 }
  0x2e   : > { %p894_p13 = pneg %p893_p11 }
  0x30   : > { %p899_p4 = pnand %p897_p1, %p894_p13 }
  0x32   : > { %902 = shalt.err (!%p899_p4)
}
  0x33   : > { %s903_s28 = scalar_lea.vmem %s163_s7, 1024  ;;  %p911_p3 = scmp.lt.s32.totalorder %s163_s7, %s163_s7 }
  0x34   : > { %p904_p2 = scmp.ne.s32.totalorder %s163_s7, %s903_s28  ;;  %p912_p6 = scmp.lt.s32.totalorder %s903_s28, %s903_s28 }
  0x36   : > { %p906_p12 = pnand %p904_p2, %p892_p9  ;;  %p913_p0 = por %p912_p6, %p911_p3 }
  0x38   : > { %p907_p10 = pneg %p906_p12 }
  0x3a   : > { %p914_p7 = pnand %p913_p0, %p907_p10 }
  0x3c   : > { %917 = shalt.err (!%p914_p7)
}
  0x3d   : > { %s1484_s10 = smov 128   ;;  %s1485_s27 = smov 8  }
  0x3e   : > { %782 = dma.hbm_to_vmem [thread:$0]  (!%p1233_p5), %s1513_s1, 1024, %s163_s7, [#allocation6], %s1484_s10, %s1484_s10, %s1485_s27  }
  0x3f   : > { %s33_s23 = sadd.s32 1, %s1098_s20  ;;  %s36_s24 = sadd.s32 1, %s1102_s21 }
  0x40   : > { %p34_p3 = scmp.ge.s32.totalorder %s33_s23, 2  ;;  %s698_s6 = sshll.u32 %s1102_s21, 1 }
  0x41   : > { %s90_s28 = sadd.s32 %s1098_s20, %s698_s6  ;;  %s176_s25 = sand.u32 1, %s1086_s17  }
  0x42   : > { %s1545_s23 = smov (%p34_p3, %s33_s23), 0  ;;  %s1547_s24 = smov (!%p34_p3, %s36_s24), %s1102_s21 }
  0x43   : > { %s41_s8 = ssub.s32 %s1098_s20, %s1545_s23  ;;  %p38_p6 = scmp.ge.s32.totalorder %s1547_s24, 2 }
  0x44   : > { %s705_s11 = sshll.u32 %s176_s25, 5  ;;  %s706_s7 = sshll.u32 %s1102_s21, 3 }
  0x45   : > { %s1549_s24 = smov (%p38_p6, %s1547_s24), 0  ;;  %s185_s15 = sadd.s32 %s1098_s20, %s706_s7 }
  0x46   : > { %s180_s6 = scalar_lea.vmem [#allocation2], %s705_s11  ;;  %s40_s27 = ssub.s32 %s1102_s21, %s1549_s24 }
  0x47   : > { %s188_s10 = sshll.u32 %s180_s6, 4  ;;  %s699_s1 = sshll.u32 %s1549_s24, 1  ;;  %s1295_s10 = int_to_ptr.vmem [resolvable:$true] %s188_s10 }
  0x48   : > { %s42_s4 = sor.u32 %s41_s8, %s40_s27  ;;  %s92_s12 = sadd.s32 %s699_s1, %s1545_s23 }
  0x49   : > { %p43_p10 = scmp.eq.s32.totalorder %s42_s4, 0  ;;  %s93_s22 = ssub.s32 %s90_s28, %s92_s12 }
  0x4a   : > { %p94_p12 = scmp.eq.s32.totalorder %s93_s22, 0  ;;  %s707_s3 = sshll.u32 %s185_s15, 7 }
  0x4b   : > { %s1514_s2 = sadd.s32 1, %s1086_s17  ;;  %s1515_s18 = sadd.s32 1, %s1074_s14 }
  0x4c   : > { %s1283_s30 = scalar_select %p43_p10, %s1086_s17, %s1514_s2  }
  0x4d   : > { %s1288_s19 = scalar_select %p94_p12, %s1074_s14, %s1515_s18  }
  0x4e   : > { %s1293_s11 = scalar_lea.hbm %s1474_s0, %s707_s3  ;;  %s1297_s1 = scalar_lea.sflag [#allocation3], %s176_s25 }
  0x4f   : > { %s918_s12 = scalar_lea.hbm %s1293_s11, 512  ;;  %p1516_p5 = scmp.ne.s32.totalorder %s1512_s9, 0 }
  0x50   : > { %p919_p0 = scmp.ne.s32.totalorder %s1293_s11, %s918_s12  ;;  %s923_s3 = scalar_lea.hbm %s1474_s0, 2048 }
  0x51   : > { %p920_p7 = pneg %p1516_p5  ;;  %p924_p11 = scmp.lt.u32.totalorder %s1293_s11, %s1474_s0 }
  0x52   : > { %p925_p13 = scmp.lt.u32.totalorder %s923_s3, %s918_s12  ;;  %p927_p4 = scmp.lt.u32.totalorder %s918_s12, %s1293_s11 }
  0x53   : > { %p921_p8 = pnand %p920_p7, %p919_p0 }
  0x54   : > { %p926_p1 = por %p925_p13, %p924_p11 }
  0x55   : > { %p922_p9 = pneg %p921_p8 }
  0x56   : > { %p928_p2 = por %p927_p4, %p926_p1 }
  0x58   : > { %p929_p3 = pnand %p928_p2, %p922_p9 }
  0x5a   : > { %932 = shalt.err (!%p929_p3)
}
  0x5b   : > { %s933_s25 = scalar_lea.vmem %s1295_s10, 512  ;;  %s1111_s4 = smov [#allocation2]  }
  0x5c   : > { %p934_p6 = scmp.ne.s32.totalorder %s1295_s10, %s933_s25  ;;  %s938_s27 = sshll.u32 %s1111_s4, 4  ;;  %s939_s27 = int_to_ptr.vmem [resolvable:$false] %s938_s27 }
  0x5d   : > { %s940_s28 = scalar_lea.vmem %s939_s27, 1024  ;;  %p941_p0 = scmp.lt.s32.totalorder %s1295_s10, %s939_s27 }
  0x5e   : > { %p936_p10 = pnand %p934_p6, %p920_p7  ;;  %p942_p8 = scmp.lt.s32.totalorder %s940_s28, %s933_s25 }
  0x60   : > { %p937_p12 = pneg %p936_p10  ;;  %p943_p11 = por %p942_p8, %p941_p0 }
  0x62   : > { %p944_p13 = pnand %p943_p11, %p937_p12 }
  0x64   : > { %947 = shalt.err (!%p944_p13)
}
  0x65   : > { %s1112_s8 = smov 256   ;;  %s1517_s15 = smov 8  }
  0x66   : > { %s1518_s6 = smov 128   ;;  %p1519_p7 = scmp.ne.s32.totalorder %s1510_s5, 0 }
  0x67   : > { %786 = dma.hbm_to_vmem [thread:$0]  (!%p1516_p5), %s1293_s11, 512, %s1295_s10, %s1297_s1, %s1112_s8, %s1518_s6, %s1517_s15  }
  0x68   : > { %200 = sbr.rel (%p1519_p7) target bundleno = 551 (0x227), region = 28  ;;  %s202_s7 = sand.u32 (!%p1519_p7), 1, %s1082_s16  }
  0x69   : > { %s709_s12 = sshll.u32 (!%p1519_p7), %s202_s7, 5  ;;  %s203_s2 = scalar_lea.sflag (!%p1519_p7), [#allocation3], %s202_s7 }
  0x6a   : > { %s206_s13 = scalar_lea.vmem (!%p1519_p7), [#allocation2], %s709_s12  ;;  %p1520_p9 = scmp.ne.s32.totalorder (!%p1519_p7), %s1505_s29, 0 }
  0x6f   : > { %1049 = dma.done.wait (%p1520_p9), %s203_s2, 512  }
  0x70   : > { %1051 = vsyncadd (%p1520_p9), %s203_s2, 4294966784  ;;  %p1521_p1 = scmp.ne.s32.totalorder %s1503_s26, 0 }
  0x72   : > { %1053 = dma.done.wait (%p1521_p1), [#allocation6], 1024  }
  0x73   : > { %1055 = vsyncadd (%p1521_p1), [#allocation6], 4294966272  ;;  %vm256_vm0 = vcmask 261120   ;;  %v240_v0 = vld [vmem:[%s206_s13] sm:$0xff]  ;;  %v241_v1 = vld [vmem:[%s206_s13 + $0x8] sm:$0xff]  ;;  %v410_v36 = vlaneseq  ;;  %s1522_s26 = sld [smem:[#allocation15_spill]] }
  0x74   : > { %v242_v2 = vld [vmem:[%s206_s13 + $0x10] sm:$0xff]  ;;  %v244_v3 = vmax.f32 %v240_v0, 0.0  ;;  %v245_v4 = vmax.f32 %v241_v1, 0.0  ;;  %v243_v5 = vld [vmem:[%s206_s13 + $0x18] sm:$0xff]  ;;  %v248_v7 = vld [vmem:[#allocation5] sm:$0xff]  ;;  %s1523_s29 = sld [smem:[#allocation17_spill]] }
  0x75   : > { %v246_v6 = vmax.f32 %v242_v2, 0.0  ;;  %v247_v8 = vmax.f32 %v243_v5, 0.0  ;;  %745 = vmatprep.mubr.msk.f32.mxu0 %vm256_vm0, %v248_v7  ;;  %v252_v9 = vld [vmem:[#allocation5 + $0x20] sm:$0xff]  ;;  %v249_v12 = vld [vmem:[#allocation5 + $0x8] sm:$0xff]  ;;  %v250_v14 = vld [vmem:[#allocation5 + $0x10] sm:$0xff]  ;;  %v411_v39 = vand.u32 127, %v410_v36 }
  0x76   : > { %v757_v10 = vpack.c.bf16 %v245_v4, %v244_v3  ;;  %751 = vmatprep.mubr.msk.f32.mxu1 %vm256_vm0, %v252_v9  ;;  %v253_v13 = vld [vmem:[#allocation5 + $0x28] sm:$0xff]  ;;  %v254_v15 = vld [vmem:[#allocation5 + $0x30] sm:$0xff]  ;;  %v251_v16 = vld [vmem:[#allocation5 + $0x18] sm:$0xff]  ;;  %v413_v42 = vshrl.u32 %v410_v36, 7  ;;  %vm421_vm1 = vcmask 130112   ;;  %vm428_vm2 = vcmask 195712  }
  0x77   : > { %v761_v11 = vpack.c.bf16 %v247_v8, %v246_v6  ;;  %v255_v17 = vld [vmem:[#allocation5 + $0x38] sm:$0xff]  ;;  %v416_v43 = vadd.s32 4294967288, %v411_v39  ;;  %v423_v45 = vadd.s32 4294967280, %v411_v39  ;;  %v430_v48 = vadd.s32 4294967272, %v411_v39  ;;  %s1524_s9 = sld [smem:[#allocation16_spill]]  ;;  %s1525_s25 = sld [smem:[#allocation19_spill]] }
  0x78   : > { %758 = vmatprep.subr.bf16.mxu0 %v757_v10  ;;  %765 = vmatprep.subr.bf16.mxu1 %v757_v10  ;;  %v414_v46 = vsub.s32 %v411_v39, %v413_v42  ;;  %v437_v49 = vadd.s32 4294967264, %v411_v39  ;;  %v444_v52 = vadd.s32 4294967256, %v411_v39  ;;  %v451_v54 = vadd.s32 4294967248, %v411_v39  ;;  %s1526_s8 = sld [smem:[#allocation22_spill]]  ;;  %s1527_s12 = sld [smem:[#allocation23_spill]] }
  0x79   : > { %760 = vmatpush3.bf16.msra.mxu0 %v757_v10  ;;  %767 = vmatpush3.bf16.msra.mxu1 %v757_v10  ;;  %v419_v50 = vsub.s32 %v416_v43, %v413_v42  ;;  %v426_v53 = vsub.s32 %v423_v45, %v413_v42  ;;  %v433_v56 = vsub.s32 %v430_v48, %v413_v42  ;;  %v458_v62 = vadd.s32 4294967240, %v411_v39  ;;  %s1349_s5 = sand.u32 1, %s1522_s26  }
  0x7a   : > { %762 = vmatprep.subr.bf16.mxu0 %v761_v11  ;;  %766 = vmatprep.subr.bf16.mxu1 %v761_v11  ;;  %v440_v58 = vsub.s32 %v437_v49, %v413_v42  ;;  %v447_v63 = vsub.s32 %v444_v52, %v413_v42  ;;  %vm435_vm3 = vcmask 261312   ;;  %v454_v1 = vsub.s32 %v451_v54, %v413_v42  ;;  %s719_s10 = sshll.u32 %s1523_s29, 1  ;;  %s229_s3 = scalar_lea.vmem [#allocation7], %s1349_s5 }
  0x7b   : > { %vm442_vm4 = vcmask 326912   ;;  %vm449_vm5 = vcmask 392512   ;;  %vm456_vm6 = vcmask 458112   ;;  %s560_s18 = sshll.u32 %s229_s3, 4  ;;  %vm463_vm7 = vcmask 523712   ;;  %s235_s22 = scalar_lea.vmem [#allocation8], %s1349_s5  ;;  %s1377_s18 = int_to_ptr.vmem [resolvable:$true] %s560_s18 }
  0x7c   : > { %vm466_vm8 = vcmask 516096   ;;  %s575_s4 = sshll.u32 %s235_s22, 4  ;;  %s542_s26 = scalar_lea.sflag [#allocation4], %s1349_s5  ;;  %s1387_s4 = int_to_ptr.vmem [resolvable:$true] %s575_s4 }
  0x7d   : > { %764 = vmatpush3.bf16.msra.mxu0 %v761_v11  ;;  %768 = vmatpush3.bf16.msra.mxu1 %v761_v11  ;;  %s1357_s11 = sadd.s32 %s1524_s9, %s719_s10  ;;  %s948_s29 = scalar_lea.vmem %s1377_s18, 16 }
  0x7e   : > { %s720_s1 = sshll.u32 %s1357_s11, 4  ;;  %s1528_s2 = smov %s1527_s12 }
  0x7f   : > { %s1375_s15 = scalar_lea.hbm %s1526_s8, %s720_s1  ;;  %s1385_s13 = scalar_lea.hbm %s1527_s12, %s720_s1 }
  0x80   : > { %746 = vmatmul.mubr.msk.f32.vlgmr.msra.gmra.mrb[0].mxu0 %vm256_vm0, %v249_v12  ;;  %752 = vmatmul.mubr.msk.f32.vlgmr.msra.gmra.mrb[0].mxu1 %vm256_vm0, %v253_v13  ;;  %v461_v13 = vsub.s32 %v458_v62, %v413_v42  ;;  %p949_p5 = scmp.ne.s32.totalorder %s1377_s18, %s948_s29  ;;  %p1529_p4 = scmp.ne.s32.totalorder %s1525_s25, 0 }
  0x81   : > { %748 = vmatprep.mubr.msk.f32.mxu0 %vm256_vm0, %v250_v14  ;;  %754 = vmatprep.mubr.msk.f32.mxu1 %vm256_vm0, %v254_v15  ;;  %s1113_s9 = smov [#allocation7]  }
  0x82   : > { %p950_p2 = pnand %p949_p5, %p1529_p4  ;;  %s952_s10 = sshll.u32 %s1113_s9, 4  ;;  %s953_s10 = int_to_ptr.vmem [resolvable:$false] %s952_s10 }
  0x83   : > { %s954_s11 = scalar_lea.vmem %s953_s10, 32  ;;  %p955_p6 = scmp.lt.s32.totalorder %s1377_s18, %s953_s10 }
  0x84   : > { %749 = vmatmul.mubr.msk.f32.gmra.mrb[2].mxu0 %vm256_vm0, %v251_v16  ;;  %755 = vmatmul.mubr.msk.f32.gmra.mrb[2].mxu1 %vm256_vm0, %v255_v17  ;;  %p951_p3 = pneg %p950_p2  ;;  %p956_p10 = scmp.lt.s32.totalorder %s954_s11, %s948_s29 }
  0x86   : > { %p957_p12 = por %p956_p10, %p955_p6 }
  0x88   : > { %p958_p0 = pnand %p957_p12, %p951_p3 }
 0x153   : > { %v747_v18 = vpop.f32.mrb[0].mxu0  ;;  %v753_v19 = vpop.f32.mrb[0].mxu1 }
 0x154   : > { %388 = vadd.xlane.f32.xlu0 %v747_v18  ;;  %v347_v20 = vpop.f32.mrb[1].mxu0  ;;  %v469_v21 = vmul.f32 %v747_v18, %v747_v18  ;;  %v367_v22 = vpop.f32.mrb[1].mxu1  ;;  %v473_v23 = vmul.f32 %v753_v19, %v753_v19 }
 0x155   : > { %v468_v28 = vmul.f32 %v347_v20, %v347_v20  ;;  %v472_v29 = vmul.f32 %v367_v22, %v367_v22 }
 0x156   : > { %478 = vadd.xlane.f32.xlu1 %v469_v21 }
 0x157   : > { %v750_v24 = vpop.f32.mrb[2].mxu0  ;;  %v756_v25 = vpop.f32.mrb[2].mxu1 }
 0x158   : > { %396 = vadd.xlane.f32.xlu0 %v753_v19  ;;  %v357_v26 = vpop.f32.mrb[3].mxu0  ;;  %v377_v27 = vpop.f32.mrb[3].mxu1  ;;  %v471_v30 = vmul.f32 %v750_v24, %v750_v24  ;;  %v475_v33 = vmul.f32 %v756_v25, %v756_v25 }
 0x159   : > { %v470_v31 = vmul.f32 %v357_v26, %v357_v26  ;;  %v474_v32 = vmul.f32 %v377_v27, %v377_v27 }
 0x15a   : > { %486 = vadd.xlane.f32.xlu1 %v473_v23 }
 0x15c   : > { %386 = vadd.xlane.f32.xlu0 %v347_v20 }
 0x15e   : > { %476 = vadd.xlane.f32.xlu1 %v468_v28 }
 0x160   : > { %394 = vadd.xlane.f32.xlu0 %v367_v22 }
 0x162   : > { %484 = vadd.xlane.f32.xlu1 %v472_v29 }
 0x164   : > { %392 = vadd.xlane.f32.xlu0 %v750_v24 }
 0x166   : > { %482 = vadd.xlane.f32.xlu1 %v471_v30 }
 0x168   : > { %390 = vadd.xlane.f32.xlu0 %v357_v26 }
 0x16a   : > { %480 = vadd.xlane.f32.xlu1 %v470_v31 }
 0x16c   : > { %398 = vadd.xlane.f32.xlu0 %v377_v27 }
 0x16e   : > { %488 = vadd.xlane.f32.xlu1 %v474_v32 }
 0x170   : > { %400 = vadd.xlane.f32.xlu0 %v756_v25 }
 0x172   : > { %490 = vadd.xlane.f32.xlu1 %v475_v33 }
 0x1e1   : > { %v389_v34 = vpop.xlane.xlu0 %388 }
 0x1e2   : > { %v420_v59 = vrot.slane %v389_v34, %v419_v50 }
 0x1e3   : > { %v479_v35 = vpop.xlane.xlu1 %478 }
 0x1e4   : > { %v507_v2 = vrot.slane %v479_v35, %v419_v50 }
 0x1e5   : > { %v397_v37 = vpop.xlane.xlu0 %396 }
 0x1e6   : > { %v448_v14 = vrot.slane %v397_v37, %v447_v63 }
 0x1e7   : > { %v1346_v38 = vpop.xlane.xlu1 %486 }
 0x1e8   : > { %v527_v21 = vrot.slane %v1346_v38, %v447_v63 }
 0x1e9   : > { %v387_v40 = vpop.xlane.xlu0 %386 }
 0x1ea   : > { %v415_v55 = vrot.slane %v387_v40, %v414_v46 }
 0x1eb   : > { %v477_v41 = vpop.xlane.xlu1 %476 }
 0x1ec   : > { %v503_v60 = vrot.slane %v477_v41, %v414_v46  ;;  %v422_v3 = vsel %vm421_vm1, %v420_v59, %v415_v55 }
 0x1ed   : > { %v395_v44 = vpop.xlane.xlu0 %394 }
 0x1ee   : > { %v441_v6 = vrot.slane %v395_v44, %v440_v58  ;;  %v508_v9 = vsel %vm421_vm1, %v507_v2, %v503_v60 }
 0x1ef   : > { %v485_v47 = vpop.xlane.xlu1 %484 }
 0x1f0   : > { %v522_v15 = vrot.slane %v485_v47, %v440_v58 }
 0x1f1   : > { %v393_v51 = vpop.xlane.xlu0 %392 }
 0x1f2   : > { %v434_v4 = vrot.slane %v393_v51, %v433_v56 }
 0x1f3   : > { %v483_v57 = vpop.xlane.xlu1 %482 }
 0x1f4   : > { %v517_v10 = vrot.slane %v483_v57, %v433_v56 }
 0x1f5   : > { %v391_v61 = vpop.xlane.xlu0 %390 }
 0x1f6   : > { %v427_v0 = vrot.slane %v391_v61, %v426_v53 }
 0x1f7   : > { %v481_v5 = vpop.xlane.xlu1 %480 }
 0x1f8   : > { %v429_v7 = vsel %vm428_vm2, %v427_v0, %v422_v3  ;;  %v512_v8 = vrot.slane %v481_v5, %v426_v53 }
 0x1f9   : > { %v436_v11 = vsel %vm435_vm3, %v434_v4, %v429_v7  ;;  %v399_v12 = vpop.xlane.xlu0 %398 }
 0x1fa   : > { %v513_v16 = vsel %vm428_vm2, %v512_v8, %v508_v9  ;;  %v443_v17 = vsel %vm442_vm4, %v441_v6, %v436_v11  ;;  %v455_v19 = vrot.slane %v399_v12, %v454_v1 }
 0x1fb   : > { %v518_v18 = vsel %vm435_vm3, %v517_v10, %v513_v16  ;;  %v489_v20 = vpop.xlane.xlu1 %488  ;;  %v450_v22 = vsel %vm449_vm5, %v448_v14, %v443_v17 }
 0x1fc   : > { %v523_v23 = vsel %vm442_vm4, %v522_v15, %v518_v18  ;;  %v532_v24 = vrot.slane %v489_v20, %v454_v1  ;;  %v457_v28 = vsel %vm456_vm6, %v455_v19, %v450_v22 }
 0x1fd   : > { %v401_v25 = vpop.xlane.xlu0 %400  ;;  %v528_v26 = vsel %vm449_vm5, %v527_v21, %v523_v23 }
 0x1fe   : > { %v462_v27 = vrot.slane %v401_v25, %v461_v13  ;;  %v533_v32 = vsel %vm456_vm6, %v532_v24, %v528_v26 }
 0x1ff   : > { %v491_v29 = vpop.xlane.xlu1 %490 }
 0x200   : > { %v464_v30 = vsel %vm463_vm7, %v462_v27, %v457_v28  ;;  %v537_v31 = vrot.slane %v491_v29, %v461_v13 }
 0x201   : > { %467 = vst.msk [vmem:[%s229_s3] sm:$0x1] %vm466_vm8, %v464_v30 }
 0x202   : > { %v538_v33 = vsel %vm463_vm7, %v537_v31, %v533_v32 }
 0x203   : > { %961 = shalt.err (!%p958_p0)
}
 0x204   : > { %s962_s1 = scalar_lea.hbm %s1375_s15, 16  ;;  %s966_s28 = scalar_lea.hbm %s1526_s8, 64 }
 0x205   : > { %p963_p8 = scmp.ne.s32.totalorder %s1375_s15, %s962_s1  ;;  %p967_p7 = scmp.lt.u32.totalorder %s1375_s15, %s1526_s8 }
 0x206   : > { %p968_p9 = scmp.lt.u32.totalorder %s966_s28, %s962_s1  ;;  %p970_p5 = scmp.lt.u32.totalorder %s962_s1, %s1375_s15 }
 0x207   : > { %p964_p11 = pnand %p963_p8, %p1529_p4 }
 0x208   : > { %p969_p1 = por %p968_p9, %p967_p7 }
 0x209   : > { %p965_p13 = pneg %p964_p11 }
 0x20a   : > { %p971_p2 = por %p970_p5, %p969_p1 }
 0x20c   : > { %p972_p3 = pnand %p971_p2, %p965_p13 }
 0x20e   : > { %975 = shalt.err (!%p972_p3)
}
 0x20f   : > { %775 = dma.vmem_to_hbm [thread:$0]  (%p1529_p4), %s1377_s18, 16, %s1375_s15, %s542_s26   ;;  %540 = vst.msk [vmem:[%s235_s22] sm:$0x1] %vm466_vm8, %v538_v33 }
 0x210   : > { %s546_s12 = scalar_lea.sflag [#allocation9], %s1349_s5  ;;  %s976_s29 = scalar_lea.vmem %s1387_s4, 16 }
 0x211   : > { %p977_p6 = scmp.ne.s32.totalorder %s1387_s4, %s976_s29  ;;  %s1114_s9 = smov [#allocation8]  }
 0x212   : > { %s980_s10 = sshll.u32 %s1114_s9, 4  ;;  %s981_s10 = int_to_ptr.vmem [resolvable:$false] %s980_s10 }
 0x213   : > { %p978_p10 = pnand %p977_p6, %p1529_p4  ;;  %s982_s11 = scalar_lea.vmem %s981_s10, 32 }
 0x214   : > { %p983_p0 = scmp.lt.s32.totalorder %s1387_s4, %s981_s10  ;;  %p984_p8 = scmp.lt.s32.totalorder %s982_s11, %s976_s29 }
 0x215   : > { %p979_p12 = pneg %p978_p10 }
 0x216   : > { %p985_p11 = por %p984_p8, %p983_p0 }
 0x218   : > { %p986_p13 = pnand %p985_p11, %p979_p12 }
 0x21a   : > { %989 = shalt.err (!%p986_p13)
}
 0x21b   : > { %s990_s5 = scalar_lea.hbm %s1385_s13, 16  ;;  %s994_s15 = scalar_lea.hbm %s1528_s2, 64 }
 0x21c   : > { %p991_p7 = scmp.ne.s32.totalorder %s1385_s13, %s990_s5  ;;  %p995_p5 = scmp.lt.u32.totalorder %s1385_s13, %s1528_s2 }
 0x21d   : > { %p996_p2 = scmp.lt.u32.totalorder %s994_s15, %s990_s5  ;;  %p998_p6 = scmp.lt.u32.totalorder %s990_s5, %s1385_s13 }
 0x21e   : > { %p992_p9 = pnand %p991_p7, %p1529_p4 }
 0x21f   : > { %p997_p3 = por %p996_p2, %p995_p5 }
 0x220   : > { %p993_p1 = pneg %p992_p9 }
 0x221   : > { %p999_p10 = por %p998_p6, %p997_p3 }
 0x223   : > { %p1000_p12 = pnand %p999_p10, %p993_p1 }
 0x225   : > { %1003 = shalt.err (!%p1000_p12)
}
 0x226   : > { %776 = dma.vmem_to_hbm [thread:$0]  (%p1529_p4), %s1387_s4, 16, %s1385_s13, %s546_s12  }
 0x227 PF: > { %s1530_s3 = sld [smem:[#allocation18_spill]]  ;;  %s1531_s27 = sld [smem:[#allocation14_spill]] }
 0x228   : > { %s1532_s28 = sld [smem:[#allocation20_spill]] }
 0x22d   : > { %p797_p0 = scmp.ge.s32.totalorder %s1530_s3, 2  ;;  %s587_s6 = sand.u32 1, %s1531_s27  }
 0x22e   : > { %p1533_p8 = scmp.ne.s32.totalorder %s1532_s28, 0  ;;  %s588_s7 = scalar_lea.sflag [#allocation4], %s587_s6 }
 0x230   : > { %p788_p11 = pnand %p797_p0, %p1533_p8 }
 0x232   : > { %1057 = dma.done.wait (!%p788_p11), %s588_s7, 16  }
 0x233   : > { %1059 = vsyncadd (!%p788_p11), %s588_s7, 4294967280  ;;  %s596_s29 = scalar_lea.sflag [#allocation9], %s587_s6 }
 0x234   : > { %1061 = dma.done.wait (!%p788_p11), %s596_s29, 16  }
 0x235   : > { %1063 = vsyncadd (!%p788_p11), %s596_s29, 4294967280  ;;  %s24_s22 = sadd.s32 1, %s1530_s3   ;;  %s1534_s12 = sld [smem:[#allocation15_spill]] }
 0x236   : > { %p21_p13 = scmp.ge.s32.totalorder %s24_s22, 6   ;;  %s1535_s13 = smov %s1074_s14 }
 0x237   : > { %s1536_s14 = smov %s1288_s19  ;;  %s1537_s15 = smov %s1082_s16 }
 0x238   : > { %s1538_s16 = smov %s1086_s17  ;;  %s1539_s17 = smov %s1283_s30 }
 0x239   : > { %s1540_s18 = smov %s1098_s20  ;;  %s1541_s19 = smov %s1102_s21 }
 0x23a   : > { %s1542_s20 = smov %s1545_s23  ;;  %s1543_s21 = smov %s1549_s24 }
 0x23b   :  { %23 = sbr.rel (!%p21_p13) target bundleno = 16 (0x10), region = 94 }
 0x242   :  { %600 = vsyncpa [#allocation3], 1 }
 0x243   :  { %602 = vsyncpa [#allocation3 + $0x1], 1 }
 0x244   :  { %603 = vsyncpa [#allocation6], 1 }
 0x245   :  { %604 = vsyncpa [#allocation4], 1 }
 0x246   :  { %606 = vsyncpa [#allocation4 + $0x1], 1 }
 0x247   :  { %607 = vsyncpa [#allocation9], 1 }
 0x248   :  { %609 = vsyncpa [#allocation9 + $0x1], 1 }

// kernel: vani_conv3d_temporal_3x1x1.3
= control target key start
LH: loop header
LB: loop body
LE: loop exit
PB: predicated region body
PF: predicated region fallthrough
CT: control target
= control target key end

     0   :  { %s1258_s0 = inlined_call_operand.hbm [shape: f32[2,32,256], index: 0, kind: input, shape index: {}]   ;;  %s1259_s1 = inlined_call_operand.hbm [shape: f32[64,32], index: 1, kind: input, shape index: {}]   ;;  %s1260_s2 = inlined_call_operand.hbm [shape: f32[64,1], index: 2, kind: input, shape index: {}]   ;;  %s1261_s3 = inlined_call_operand.hbm [shape: f32[2,64,256], index: 3, kind: output, shape index: {}]  }
   0x1   :  { %1269 = sst [smem:[#allocation13_spill]] %s1259_s1 }
   0x2   :  { %8 = vsyncpa [#allocation3], 0 }
   0x3   :  { %10 = vsyncpa [#allocation3 + $0x1], 0 }
   0x4   :  { %11 = vsyncpa [#allocation6], 0 }
   0x5   :  { %12 = vsyncpa [#allocation4], 0 }
   0x6   :  { %14 = vsyncpa [#allocation4 + $0x1], 0  ;;  %s959_s12 = smov 0   ;;  %s961_s13 = smov 0  }
   0x7   :  { %s963_s14 = smov 0   ;;  %s965_s15 = smov 0  }
   0x8   :  { %s967_s16 = smov 0   ;;  %s969_s17 = smov 0  }
   0x9   :  { %s971_s18 = smov 0   ;;  %s973_s19 = smov 0  }
   0xa LB: > { %s559_s20 = sadd.s32 4294967295, %s926_s19   ;;  %s560_s21 = sadd.s32 4294967294, %s926_s19   ;;  %s926_s19 = sphi %s973_s19, %s20_s19   ;;  %s922_s18 = sphi %s971_s18, %s1295_s18   ;;  %s918_s17 = sphi %s969_s17, %s1294_s17   ;;  %s914_s16 = sphi %s967_s16, %s1293_s16   ;;  %s910_s15 = sphi %s965_s15, %s1292_s15   ;;  %s906_s14 = sphi %s963_s14, %s1291_s14   ;;  %s902_s13 = sphi %s961_s13, %s1290_s13   ;;  %s898_s12 = sphi %s959_s12, %s1289_s12  }
   0xb   : > { %p48_p0 = scmp.ne.s32.totalorder %s906_s14, %s902_s13  ;;  %p49_p1 = scmp.eq.s32.totalorder %s926_s19, 0 }
   0xc   : > { %p54_p2 = scmp.ne.s32.totalorder %s902_s13, %s898_s12  ;;  %p1007_p3 = scmp.eq.s32.totalorder %s559_s20, 0 }
   0xd   : > { %p122_p4 = scmp.eq.s32.totalorder %s559_s20, 3  ;;  %p1011_p5 = por %p49_p1, %p48_p0 }
   0xe   : > { %s1270_s23 = scalar_select %p1007_p3, 1, 0 }
   0xf   : > { %p128_p6 = scmp.eq.s32.totalorder %s560_s21, 3  ;;  %p1017_p7 = por %p1007_p3, %p54_p2 }
  0x10   : > { %p1021_p8 = por %p122_p4, %p48_p0  ;;  %p561_p10 = scmp.ge.s32.totalorder %s926_s19, 1 }
  0x11   : > { %s1272_s25 = scalar_select %p1017_p7, 1, 0 }
  0x12   : > { %s1273_s26 = scalar_select %p1021_p8, 1, 0 }
  0x13   : > { %p1025_p9 = por %p128_p6, %p54_p2  ;;  %p135_p11 = scmp.lt.s32.totalorder %s926_s19, 5 }
  0x14   : > { %s928_s29 = smov [#allocation5]   ;;  %p659_p0 = scmp.lt.s32.totalorder %s926_s19, 4 }
  0x15   : > { %s1274_s27 = scalar_select %p1025_p9, 1, 0 }
  0x16   : > { %p1031_p12 = pnand %p561_p10, %p135_p11  ;;  %s147_s30 = sshll.u32 %s928_s29, 4  ;;  %s1035_s30 = int_to_ptr.vmem [resolvable:$true] %s147_s30 }
  0x17   : > { %1275 = sst [smem:[#allocation12_spill]] %s1274_s27  ;;  %s929_s5 = smov [#allocation7]  }
  0x18   : > { %p642_p13 = pneg %p1031_p12  ;;  %s160_s6 = sshll.u32 %s929_s5, 4  ;;  %s1052_s6 = int_to_ptr.vmem [resolvable:$true] %s160_s6 }
  0x19   : > { %p1048_p2 = pnand %p659_p0, %p1011_p5  ;;  %s1279_s1 = sld [smem:[#allocation13_spill]] }
  0x1a   : > { %p1042_p1 = pnand %p642_p13, %p1007_p3 }
  0x1c   : > { %p740_p6 = pneg %p1042_p1 }
  0x1f   : > { %s738_s10 = scalar_lea.hbm %s1279_s1, 1024 }
  0x20   : > { %p739_p4 = scmp.ne.s32.totalorder %s1279_s1, %s738_s10  ;;  %p745_p5 = scmp.lt.u32.totalorder %s738_s10, %s1279_s1 }
  0x22   : > { %p741_p10 = pnand %p740_p6, %p739_p4 }
  0x24   : > { %p742_p11 = pneg %p741_p10 }
  0x26   : > { %p747_p13 = pnand %p745_p5, %p742_p11 }
  0x28   : > { %750 = shalt.err (!%p747_p13)
}
  0x29   : > { %s751_s29 = scalar_lea.vmem %s1035_s30, 1024  ;;  %p759_p3 = scmp.lt.s32.totalorder %s1035_s30, %s1035_s30 }
  0x2a   : > { %p752_p0 = scmp.ne.s32.totalorder %s1035_s30, %s751_s29  ;;  %p760_p4 = scmp.lt.s32.totalorder %s751_s29, %s751_s29 }
  0x2c   : > { %p754_p9 = pnand %p752_p0, %p740_p6  ;;  %p761_p10 = por %p760_p4, %p759_p3 }
  0x2e   : > { %p755_p8 = pneg %p754_p9 }
  0x30   : > { %p762_p7 = pnand %p761_p10, %p755_p8 }
  0x32   : > { %765 = shalt.err (!%p762_p7)
}
  0x33   : > { %s1267_s5 = smov 128   ;;  %s1268_s8 = smov 8  }
  0x34   : > { %645 = dma.hbm_to_vmem [thread:$0]  (!%p1042_p1), %s1279_s1, 1024, %s1035_s30, [#allocation6], %s1267_s5, %s1267_s5, %s1268_s8  }
  0x35   : > { %s766_s21 = scalar_lea.hbm %s1260_s2, 1024 }
  0x36   : > { %p767_p3 = scmp.ne.s32.totalorder %s1260_s2, %s766_s21  ;;  %p773_p9 = scmp.lt.u32.totalorder %s766_s21, %s1260_s2 }
  0x38   : > { %p769_p7 = pnand %p767_p3, %p740_p6 }
  0x3a   : > { %p770_p8 = pneg %p769_p7 }
  0x3c   : > { %p775_p11 = pnand %p773_p9, %p770_p8 }
  0x3e   : > { %778 = shalt.err (!%p775_p11)
}
  0x3f   : > { %s779_s30 = scalar_lea.vmem %s1052_s6, 1024  ;;  %p787_p4 = scmp.lt.s32.totalorder %s1052_s6, %s1052_s6 }
  0x40   : > { %p780_p5 = scmp.ne.s32.totalorder %s1052_s6, %s779_s30  ;;  %p788_p10 = scmp.lt.s32.totalorder %s779_s30, %s779_s30 }
  0x42   : > { %p782_p13 = pnand %p780_p5, %p740_p6  ;;  %p789_p3 = por %p788_p10, %p787_p4 }
  0x44   : > { %p783_p0 = pneg %p782_p13 }
  0x46   : > { %p790_p7 = pnand %p789_p3, %p783_p0 }
  0x48   : > { %793 = shalt.err (!%p790_p7)
}
  0x49   : > { %648 = dma.hbm_to_vmem [thread:$0]  (!%p1042_p1), %s1260_s2, 1024, %s1052_s6, [#allocation6], %s1267_s5, %s1267_s5, %s1268_s8  }
  0x4a   : > { %s29_s9 = sadd.s32 1, %s918_s17  ;;  %s32_s10 = sadd.s32 1, %s922_s18 }
  0x4b   : > { %p30_p6 = scmp.ge.s32.totalorder %s29_s9, 2  ;;  %s174_s4 = sand.u32 1, %s906_s14  }
  0x4c   : > { %s565_s11 = sshll.u32 %s174_s4, 5  ;;  %s566_s21 = sshll.u32 %s922_s18, 3 }
  0x4d   : > { %s1297_s9 = smov (%p30_p6, %s29_s9), 0  ;;  %s1299_s10 = smov (!%p30_p6, %s32_s10), %s922_s18 }
  0x4e   : > { %s37_s20 = ssub.s32 %s918_s17, %s1297_s9  ;;  %p34_p8 = scmp.ge.s32.totalorder %s1299_s10, 2 }
  0x4f   : > { %s183_s24 = sadd.s32 %s918_s17, %s566_s21  ;;  %s178_s29 = scalar_lea.vmem [#allocation2], %s565_s11 }
  0x50   : > { %s186_s30 = sshll.u32 %s178_s29, 4  ;;  %s1301_s10 = smov (%p34_p8, %s1299_s10), 0  ;;  %s1124_s30 = int_to_ptr.vmem [resolvable:$true] %s186_s30 }
  0x51   : > { %s567_s6 = sshll.u32 %s183_s24, 7  ;;  %s36_s22 = ssub.s32 %s922_s18, %s1301_s10 }
  0x52   : > { %s1131_s8 = scalar_lea.hbm %s1258_s0, %s567_s6  ;;  %s1133_s1 = sor.u32 %s37_s20, %s36_s22 }
  0x53   : > { %s1136_s11 = scalar_lea.sflag [#allocation3], %s174_s4  ;;  %s794_s21 = scalar_lea.hbm %s1131_s8, 512 }
  0x54   : > { %p795_p9 = scmp.ne.s32.totalorder %s1131_s8, %s794_s21  ;;  %p796_p11 = pneg %p1048_p2 }
  0x55   : > { %s799_s29 = scalar_lea.hbm %s1258_s0, 2048  ;;  %p800_p0 = scmp.lt.u32.totalorder %s1131_s8, %s1258_s0 }
  0x56   : > { %p797_p5 = pnand %p796_p11, %p795_p9  ;;  %p801_p4 = scmp.lt.u32.totalorder %s799_s29, %s794_s21 }
  0x57   : > { %p803_p3 = scmp.lt.u32.totalorder %s794_s21, %s1131_s8 }
  0x58   : > { %p798_p13 = pneg %p797_p5  ;;  %p802_p10 = por %p801_p4, %p800_p0 }
  0x5a   : > { %p804_p7 = por %p803_p3, %p802_p10 }
  0x5c   : > { %p805_p6 = pnand %p804_p7, %p798_p13 }
  0x5e   : > { %808 = shalt.err (!%p805_p6)
}
  0x5f   : > { %s809_s4 = scalar_lea.vmem %s1124_s30, 512  ;;  %s932_s20 = smov [#allocation2]  }
  0x60   : > { %p810_p8 = scmp.ne.s32.totalorder %s1124_s30, %s809_s4  ;;  %s814_s22 = sshll.u32 %s932_s20, 4  ;;  %s815_s22 = int_to_ptr.vmem [resolvable:$false] %s814_s22 }
  0x61   : > { %s816_s5 = scalar_lea.vmem %s815_s22, 1024  ;;  %p817_p1 = scmp.lt.s32.totalorder %s1124_s30, %s815_s22 }
  0x62   : > { %p812_p9 = pnand %p810_p8, %p796_p11  ;;  %p818_p0 = scmp.lt.s32.totalorder %s816_s5, %s809_s4 }
  0x64   : > { %p813_p5 = pneg %p812_p9  ;;  %p819_p4 = por %p818_p0, %p817_p1 }
  0x66   : > { %p820_p10 = pnand %p819_p4, %p813_p5 }
  0x68   : > { %823 = shalt.err (!%p820_p10)
}
  0x69   : > { %s933_s21 = smov 256   ;;  %s1280_s24 = smov 8  }
  0x6a   : > { %s1281_s29 = smov 128   ;;  %s1282_s6 = sadd.s32 1, %s906_s14 }
  0x6b   : > { %652 = dma.hbm_to_vmem [thread:$0]  (!%p1048_p2), %s1131_s8, 512, %s1124_s30, %s1136_s11, %s933_s21, %s1281_s29, %s1280_s24  }
  0x6c   : > { %p1283_p11 = scmp.eq.s32.totalorder %s1133_s1, 0  ;;  %198 = sbr.rel (%p1031_p12) target bundleno = 367 (0x16f), region = 32 }
  0x6d   : > { %s1176_s4 = sand.u32 (!%p1031_p12), 1, %s902_s13   ;;  %p1284_p1 = scmp.ne.s32.totalorder (!%p1031_p12), %s1272_s25, 0 }
  0x6e   : > { %s1171_s27 = scalar_select %p1283_p11, %s906_s14, %s1282_s6  }
  0x6f   : > { %s569_s7 = sshll.u32 (!%p1031_p12), %s1176_s4, 5  ;;  %s201_s20 = scalar_lea.sflag (!%p1031_p12), [#allocation3], %s1176_s4 }
  0x70   : > { %s204_s22 = scalar_lea.vmem (!%p1031_p12), [#allocation2], %s569_s7 }
  0x73   : > { %885 = dma.done.wait (%p1284_p1), %s201_s20, 512  }
  0x74   : > { %887 = vsyncadd (%p1284_p1), %s201_s20, 4294966784  ;;  %p1285_p2 = scmp.ne.s32.totalorder %s1270_s23, 0 }
  0x76   : > { %889 = dma.done.wait (%p1285_p2), [#allocation6], 2048  }
  0x77   : > { %891 = vsyncadd (%p1285_p2), [#allocation6], 4294965248  ;;  %v934_v0 = vmov 0   ;;  %vm299_vm0 = vcmask 261120   ;;  %v235_v1 = vld [vmem:[%s204_s22] sm:$0xff]  ;;  %v236_v2 = vld [vmem:[%s204_s22 + $0x8] sm:$0xff] }
  0x78   : > { %737 = vset.pattern.permute.xlu1 %v934_v0  ;;  %736 = vset.pattern.permute.xlu0 %v934_v0  ;;  %v237_v3 = vld [vmem:[%s204_s22 + $0x10] sm:$0xff]  ;;  %v239_v4 = vmax.f32 %v235_v1, 0.0  ;;  %v240_v5 = vmax.f32 %v236_v2, 0.0  ;;  %v238_v6 = vld [vmem:[%s204_s22 + $0x18] sm:$0xff]  ;;  %v243_v8 = vld [vmem:[#allocation5] sm:$0xff]  ;;  %s582_s1 = sshll.u32 %s914_s16, 4 }
  0x79   : > { %v241_v7 = vmax.f32 %v237_v3, 0.0  ;;  %v247_v9 = vld [vmem:[#allocation5 + $0x20] sm:$0xff]  ;;  %v242_v10 = vmax.f32 %v238_v6, 0.0  ;;  %606 = vmatprep.mubr.msk.f32.mxu0 %vm299_vm0, %v243_v8  ;;  %v253_v13 = vld [vmem:[#allocation7 + $0x10] sm:$0xff]  ;;  %v254_v15 = vld [vmem:[#allocation7 + $0x18] sm:$0xff]  ;;  %s572_s23 = sshll.u32 %s1176_s4, 6  ;;  %s449_s25 = sadd.s32 %s910_s15, %s582_s1 }
  0x7a   : > { %612 = vmatprep.mubr.msk.f32.mxu1 %vm299_vm0, %v247_v9  ;;  %v618_v11 = vpack.c.bf16 %v240_v5, %v239_v4  ;;  %v251_v14 = vld [vmem:[#allocation7] sm:$0xff]  ;;  %271 = vperm.xlu1 %737, %v253_v13   ;;  %v252_v16 = vld [vmem:[#allocation7 + $0x8] sm:$0xff]  ;;  %v245_v19 = vld [vmem:[#allocation5 + $0x10] sm:$0xff]  ;;  %s234_s28 = scalar_lea.vmem [#allocation8], %s572_s23  ;;  %s583_s30 = sshll.u32 %s449_s25, 7 }
  0x7b   : > { %v622_v12 = vpack.c.bf16 %v242_v10, %v241_v7  ;;  %261 = vperm.xlu0 %736, %v251_v14   ;;  %v244_v17 = vld [vmem:[#allocation5 + $0x8] sm:$0xff]  ;;  %v249_v20 = vld [vmem:[#allocation5 + $0x30] sm:$0xff]  ;;  %v255_v22 = vld [vmem:[#allocation7 + $0x20] sm:$0xff]  ;;  %s452_s8 = sshll.u32 %s234_s28, 4  ;;  %s1204_s11 = scalar_lea.hbm %s1261_s3, %s583_s30  ;;  %s1199_s8 = int_to_ptr.vmem [resolvable:$true] %s452_s8 }
  0x7c   : > { %619 = vmatprep.subr.bf16.mxu0 %v618_v11  ;;  %626 = vmatprep.subr.bf16.mxu1 %v618_v11  ;;  %v248_v18 = vld [vmem:[#allocation5 + $0x28] sm:$0xff]  ;;  %v246_v23 = vld [vmem:[#allocation5 + $0x18] sm:$0xff]  ;;  %v257_v26 = vld [vmem:[#allocation7 + $0x30] sm:$0xff]  ;;  %s438_s5 = scalar_lea.sflag [#allocation4], %s1176_s4  ;;  %s824_s21 = scalar_lea.vmem %s1199_s8, 1024 }
  0x7d   : > { %621 = vmatpush3.bf16.msra.mxu0 %v618_v11  ;;  %628 = vmatpush3.bf16.msra.mxu1 %v618_v11  ;;  %v256_v21 = vld [vmem:[#allocation7 + $0x28] sm:$0xff]  ;;  %v250_v24 = vld [vmem:[#allocation5 + $0x38] sm:$0xff]  ;;  %p825_p12 = scmp.ne.s32.totalorder %s1199_s8, %s824_s21  ;;  %p1286_p13 = scmp.ne.s32.totalorder %s1273_s26, 0 }
  0x7e   : > { %623 = vmatprep.subr.bf16.mxu0 %v622_v12  ;;  %627 = vmatprep.subr.bf16.mxu1 %v622_v12  ;;  %v258_v25 = vld [vmem:[#allocation7 + $0x38] sm:$0xff]  ;;  %s935_s24 = smov [#allocation8]  }
  0x7f   : > { %276 = vperm.xlu1 %737, %v254_v15   ;;  %266 = vperm.xlu0 %736, %v252_v16   ;;  %p826_p3 = pnand %p825_p12, %p1286_p13  ;;  %s828_s29 = sshll.u32 %s935_s24, 4  ;;  %s829_s29 = int_to_ptr.vmem [resolvable:$false] %s828_s29 }
  0x80   : > { %s830_s6 = scalar_lea.vmem %s829_s29, 2048  ;;  %p831_p6 = scmp.lt.s32.totalorder %s1199_s8, %s829_s29 }
  0x81   : > { %625 = vmatpush3.bf16.msra.mxu0 %v622_v12  ;;  %629 = vmatpush3.bf16.msra.mxu1 %v622_v12  ;;  %p827_p7 = pneg %p826_p3  ;;  %p832_p8 = scmp.lt.s32.totalorder %s830_s6, %s824_s21 }
  0x83   : > { %286 = vperm.xlu1 %737, %v256_v21   ;;  %281 = vperm.xlu0 %736, %v255_v22   ;;  %p833_p9 = por %p832_p8, %p831_p6 }
  0x84   : > { %607 = vmatmul.mubr.msk.f32.vlgmr.msra.gmra.mrb[0].mxu0 %vm299_vm0, %v244_v17  ;;  %613 = vmatmul.mubr.msk.f32.vlgmr.msra.gmra.mrb[0].mxu1 %vm299_vm0, %v248_v18 }
  0x85   : > { %609 = vmatprep.mubr.msk.f32.mxu0 %vm299_vm0, %v245_v19  ;;  %615 = vmatprep.mubr.msk.f32.mxu1 %vm299_vm0, %v249_v20  ;;  %p834_p5 = pnand %p833_p9, %p827_p7 }
  0x87   : > { %296 = vperm.xlu1 %737, %v258_v25   ;;  %291 = vperm.xlu0 %736, %v257_v26  }
  0x88   : > { %610 = vmatmul.mubr.msk.f32.gmra.mrb[2].mxu0 %vm299_vm0, %v246_v23  ;;  %616 = vmatmul.mubr.msk.f32.gmra.mrb[2].mxu1 %vm299_vm0, %v250_v24 }
  0xf9   : > { %v272_v27 = vpop.permute.xlu1 %271 }
  0xfa   : > { %v262_v28 = vpop.permute.xlu0 %261 }
  0xfe   : > { %v277_v29 = vpop.permute.xlu1 %276  ;;  %v267_v30 = vpop.permute.xlu0 %266 }
 0x102   : > { %v287_v31 = vpop.permute.xlu1 %286  ;;  %v282_v32 = vpop.permute.xlu0 %281 }
 0x106   : > { %v297_v41 = vpop.permute.xlu1 %296  ;;  %v292_v42 = vpop.permute.xlu0 %291 }
 0x157   : > { %v608_v33 = vpop.f32.mrb[0].mxu0  ;;  %v614_v34 = vpop.f32.mrb[0].mxu1 }
 0x158   : > { %v396_v35 = vadd.f32 %v608_v33, %v267_v30  ;;  %v416_v36 = vadd.f32 %v614_v34, %v287_v31  ;;  %v390_v37 = vpop.f32.mrb[1].mxu0  ;;  %v410_v38 = vpop.f32.mrb[1].mxu1 }
 0x159   : > { %v391_v39 = vadd.f32 %v390_v37, %v262_v28  ;;  %v411_v40 = vadd.f32 %v410_v38, %v282_v32 }
 0x15a   : > { %430 = vst [vmem:[%s234_s28 + $0x8] sm:$0xff] %v396_v35  ;;  %434 = vst [vmem:[%s234_s28 + $0x28] sm:$0xff] %v416_v36 }
 0x15b   : > { %429 = vst [vmem:[%s234_s28] sm:$0xff] %v391_v39  ;;  %433 = vst [vmem:[%s234_s28 + $0x20] sm:$0xff] %v411_v40  ;;  %v611_v43 = vpop.f32.mrb[2].mxu0  ;;  %v617_v44 = vpop.f32.mrb[2].mxu1 }
 0x15c   : > { %v406_v45 = vadd.f32 %v611_v43, %v277_v29  ;;  %v426_v46 = vadd.f32 %v617_v44, %v297_v41  ;;  %v400_v47 = vpop.f32.mrb[3].mxu0  ;;  %v420_v48 = vpop.f32.mrb[3].mxu1 }
 0x15d   : > { %v401_v49 = vadd.f32 %v400_v47, %v272_v27  ;;  %v421_v50 = vadd.f32 %v420_v48, %v292_v42 }
 0x15e   : > { %432 = vst [vmem:[%s234_s28 + $0x18] sm:$0xff] %v406_v45  ;;  %436 = vst [vmem:[%s234_s28 + $0x38] sm:$0xff] %v426_v46 }
 0x15f   : > { %431 = vst [vmem:[%s234_s28 + $0x10] sm:$0xff] %v401_v49  ;;  %435 = vst [vmem:[%s234_s28 + $0x30] sm:$0xff] %v421_v50 }
 0x160   : > { %837 = shalt.err (!%p834_p5)
}
 0x161   : > { %s838_s7 = scalar_lea.hbm %s1204_s11, 1024  ;;  %s842_s1 = scalar_lea.hbm %s1261_s3, 4096 }
 0x162   : > { %p839_p0 = scmp.ne.s32.totalorder %s1204_s11, %s838_s7  ;;  %p843_p11 = scmp.lt.u32.totalorder %s1204_s11, %s1261_s3 }
 0x163   : > { %p844_p1 = scmp.lt.u32.totalorder %s842_s1, %s838_s7  ;;  %p846_p12 = scmp.lt.u32.totalorder %s838_s7, %s1204_s11 }
 0x164   : > { %p840_p4 = pnand %p839_p0, %p1286_p13 }
 0x165   : > { %p845_p2 = por %p844_p1, %p843_p11 }
 0x166   : > { %p841_p10 = pneg %p840_p4 }
 0x167   : > { %p847_p3 = por %p846_p12, %p845_p2 }
 0x169   : > { %p848_p7 = pnand %p847_p3, %p841_p10 }
 0x16b   : > { %851 = shalt.err (!%p848_p7)
}
 0x16c   : > { %s936_s28 = smov 128   ;;  %s937_s30 = smov 256  }
 0x16d   : > { %s938_s15 = smov 8  }
 0x16e   : > { %640 = dma.vmem_to_hbm [thread:$0]  (%p1286_p13), %s1199_s8, 1024, %s1204_s11, %s438_s5, %s936_s28, %s937_s30, %s938_s15  }
 0x16f PF: > { %s1287_s16 = sld [smem:[#allocation12_spill]]  ;;  %p662_p6 = scmp.ge.s32.totalorder %s926_s19, 2 }
 0x170   : > { %s467_s21 = sand.u32 1, %s898_s12  }
 0x171   : > { %s468_s24 = scalar_lea.sflag [#allocation4], %s467_s21 }
 0x175   : > { %p1288_p8 = scmp.ne.s32.totalorder %s1287_s16, 0 }
 0x177   : > { %p654_p9 = pnand %p662_p6, %p1288_p8 }
 0x179   : > { %893 = dma.done.wait (!%p654_p9), %s468_s24, 1024  }
 0x17a   : > { %895 = vsyncadd (!%p654_p9), %s468_s24, 4294966272  ;;  %s20_s19 = sadd.s32 1, %s926_s19   ;;  %s1289_s12 = smov %s902_s13 }
 0x17b   : > { %p17_p5 = scmp.ge.s32.totalorder %s20_s19, 6   ;;  %s1290_s13 = smov %s906_s14 }
 0x17c   : > { %s1291_s14 = smov %s1171_s27  ;;  %s1292_s15 = smov %s918_s17 }
 0x17d   : > { %s1293_s16 = smov %s922_s18  ;;  %s1294_s17 = smov %s1297_s9 }
 0x17e   : > { %s1295_s18 = smov %s1301_s10  ;;  %19 = sbr.rel (!%p17_p5) target bundleno = 10 (0xa), region = 85 }
 0x185   :  { %473 = vsyncpa [#allocation3], 1 }
 0x186   :  { %475 = vsyncpa [#allocation3 + $0x1], 1 }
 0x187   :  { %476 = vsyncpa [#allocation6], 1 }
 0x188   :  { %477 = vsyncpa [#allocation4], 1 }
 0x189   :  { %479 = vsyncpa [#allocation4 + $0x1], 1 }

</bundles_post_ra>
